<compile_context>
chip_gen: v7x
topology: tpu7x:2x2x1
jax: 0.10.0
libtpu: 0.0.40
codegen_flags: <defaults>
</compile_context>

<pallas_src>
import math

import jax
import jax.numpy as jnp
import numpy as np
from jax import lax
from jax.experimental import pallas as pl
from jax.experimental.pallas import tpu as pltpu


_PAD = 8  # sublane-aligned zero padding used for the +/-1 time-shift reads


def _make_kernel(B, L):
    L2, L3 = L // 2, L // 4
    BL, BL2, BL3 = B * L, B * L2, B * L3
    f32 = jnp.float32
    bf16 = jnp.bfloat16

    def kernel(x_ref, w1_ref, b1_ref, w2_ref, b2_ref,
               wf1_ref, bf1_ref, wf2_ref, bf2_ref, o_ref,
               xpad_ref, hbuf_ref, h2pad_ref, gbuf_ref):
        # ---- conv1: Conv1d(1, 64, k=3, pad=1) + ReLU  (pure VPU) ----
        # Zero-padded copy of x so the +/-1 time shifts are plain offset reads.
        xpad_ref[...] = jnp.zeros_like(xpad_ref)
        xpad_ref[pl.ds(_PAD, BL), :] = x_ref[...]

        x = x_ref[...]                                  # (BL, 1)
        xm1 = xpad_ref[pl.ds(_PAD - 1, BL), :]          # x[t-1]
        xp1 = xpad_ref[pl.ds(_PAD + 1, BL), :]          # x[t+1]
        row = lax.broadcasted_iota(jnp.int32, (BL, 1), 0)
        xm1 = jnp.where(row % L == 0, 0.0, xm1)         # zero across batch boundary
        xp1 = jnp.where(row % L == L - 1, 0.0, xp1)

        w1 = w1_ref[...]                                # (3, 64): w1[k, co]
        h = xm1 * w1[0:1, :] + x * w1[1:2, :] + xp1 * w1[2:3, :] + b1_ref[...]
        h = jnp.maximum(h, 0.0)                         # (BL, 64)

        # ---- pool1: MaxPool1d(2) — even/odd strided reads + VPU max ----
        hbuf_ref[...] = h
        h2 = jnp.maximum(hbuf_ref[pl.ds(0, BL2, stride=2), :],
                         hbuf_ref[pl.ds(1, BL2, stride=2), :])      # (BL2, 64)

        # ---- conv2: Conv1d(64, 128, k=3, pad=1) + ReLU  (bf16 MXU, f32 acc) ----
        h2pad_ref[...] = jnp.zeros_like(h2pad_ref)
        h2pad_ref[pl.ds(_PAD, BL2), :] = h2
        hm1 = h2pad_ref[pl.ds(_PAD - 1, BL2), :]        # h2[t-1]
        hp1 = h2pad_ref[pl.ds(_PAD + 1, BL2), :]        # h2[t+1]
        row2 = lax.broadcasted_iota(jnp.int32, (BL2, 1), 0)
        hm1 = jnp.where(row2 % L2 == 0, 0.0, hm1)
        hp1 = jnp.where(row2 % L2 == L2 - 1, 0.0, hp1)

        w2 = w2_ref[...]                                # (192, 128) bf16, rows k*64+ci
        g = (jnp.dot(hm1.astype(bf16), w2[0:64, :], preferred_element_type=f32)
             + jnp.dot(h2.astype(bf16), w2[64:128, :], preferred_element_type=f32)
             + jnp.dot(hp1.astype(bf16), w2[128:192, :], preferred_element_type=f32))
        g = jnp.maximum(g + b2_ref[...], 0.0)           # (BL2, 128)

        # ---- pool2: MaxPool1d(2) ----
        gbuf_ref[...] = g
        g2 = jnp.maximum(gbuf_ref[pl.ds(0, BL3, stride=2), :],
                         gbuf_ref[pl.ds(1, BL3, stride=2), :])      # (BL3, 128)

        # ---- torch.mean(x, dim=(2, 0)) == mean over all (batch, time) rows ----
        v = jnp.sum(g2, axis=0, keepdims=True) * (1.0 / BL3)        # (1, 128)

        # ---- fc1 + ReLU, fc2 (f32; tiny GEMVs, lane-padded output store) ----
        z = jnp.maximum(
            jnp.dot(v, wf1_ref[...], preferred_element_type=f32) + bf1_ref[...],
            0.0)                                        # (1, embed_dim)
        o_ref[...] = (jnp.dot(z, wf2_ref[...], preferred_element_type=f32)
                      + bf2_ref[...])                   # (1, padded O*E)

    return kernel


def conv_seq_reducer_forward(x, params, *, output_size, embed_dim):
    """Pallas forward of ConvolutionalSequenceReducer. x: (B, L) f32."""
    B, L = x.shape
    assert L % 4 == 0, "length must survive two MaxPool1d(2) stages cleanly"
    conv1_w, conv1_b, conv2_w, conv2_b, fc1_w, fc1_b, fc2_w, fc2_b = params

    OE = output_size * embed_dim
    OE_pad = ((OE + 127) // 128) * 128                  # lane-dense output store

    # Parameter re-layouts (glue, plain JAX).
    w1t = jnp.transpose(conv1_w[:, 0, :])                              # (3, 64)
    b1r = conv1_b.reshape(1, -1)                                       # (1, 64)
    w2m = jnp.transpose(conv2_w, (2, 1, 0)).reshape(3 * 64, 128)       # (192, 128)
    w2m = w2m.astype(jnp.bfloat16)                                     # bf16 MXU path
    b2r = conv2_b.reshape(1, -1)                                       # (1, 128)
    wf1 = jnp.transpose(fc1_w)                                         # (128, E)
    bf1 = fc1_b.reshape(1, -1)                                         # (1, E)
    wf2 = jnp.pad(jnp.transpose(fc2_w), ((0, 0), (0, OE_pad - OE)))    # (E, OE_pad)
    bf2 = jnp.pad(fc2_b.reshape(1, -1), ((0, 0), (0, OE_pad - OE)))    # (1, OE_pad)

    kernel = _make_kernel(B, L)
    vmem_specs = [pl.BlockSpec(memory_space=pltpu.MemorySpace.VMEM) for _ in range(9)]
    out = pl.pallas_call(
        kernel,
        out_shape=jax.ShapeDtypeStruct((1, OE_pad), jnp.float32),
        in_specs=vmem_specs,
        out_specs=pl.BlockSpec(memory_space=pltpu.MemorySpace.VMEM),
        scratch_shapes=[
            pltpu.VMEM((B * L + 2 * _PAD, 1), jnp.float32),        # padded x
            pltpu.VMEM((B * L, 64), jnp.float32),                  # pre-pool1 h
            pltpu.VMEM((B * L // 2 + 2 * _PAD, 64), jnp.float32),  # padded pooled h
            pltpu.VMEM((B * L // 2, 128), jnp.float32),            # pre-pool2 g
        ],
    )(x.reshape(B * L, 1), w1t, b1r, w2m, b2r, wf1, bf1, wf2, bf2)
    return out[:, :OE].reshape(output_size, embed_dim)   # == torch .view(O, E)


def torch_like_reference(x, params, *, output_size, embed_dim):
    """Pure-JAX reference mirroring the PyTorch forward exactly (f32)."""
    conv1_w, conv1_b, conv2_w, conv2_b, fc1_w, fc1_b, fc2_w, fc2_b = params
    B, L = x.shape
    xp = jnp.pad(x, ((0, 0), (1, 1)))
    win1 = jnp.stack([xp[:, k:k + L] for k in range(3)], axis=-1)       # (B, L, 3)
    h = jnp.einsum('blk,ok->bol', win1, conv1_w[:, 0, :]) + conv1_b[None, :, None]
    h = jnp.maximum(h, 0.0)                                             # (B, 64, L)
    h = jnp.max(h.reshape(B, 64, L // 2, 2), axis=-1)                   # (B, 64, L/2)
    L2 = L // 2
    hp = jnp.pad(h, ((0, 0), (0, 0), (1, 1)))
    win2 = jnp.stack([hp[:, :, k:k + L2] for k in range(3)], axis=-1)   # (B,64,L2,3)
    g = jnp.einsum('bclk,ock->bol', win2, conv2_w) + conv2_b[None, :, None]
    g = jnp.maximum(g, 0.0)                                             # (B,128,L2)
    g = jnp.max(g.reshape(B, 128, L2 // 2, 2), axis=-1)                 # (B,128,L2/2)
    v = jnp.mean(g, axis=(2, 0))                                        # (128,)
    z = jnp.maximum(fc1_w @ v + fc1_b, 0.0)
    z = fc2_w @ z + fc2_b
    return z.reshape(output_size, embed_dim)


if __name__ == "__main__":
    B, L = 2, 16
    EMBED_DIM, OUTPUT_SIZE = 32, 10

    key = jax.random.PRNGKey(0)
    ks = jax.random.split(key, 9)

    def uinit(k, shape, fan_in):
        bound = 1.0 / math.sqrt(fan_in)
        return jax.random.uniform(k, shape, jnp.float32, -bound, bound)

    # Deterministic synthetic parameters (PyTorch-default-style uniform init).
    conv1_w = uinit(ks[0], (64, 1, 3), 1 * 3)
    conv1_b = uinit(ks[1], (64,), 1 * 3)
    conv2_w = uinit(ks[2], (128, 64, 3), 64 * 3)
    conv2_b = uinit(ks[3], (128,), 64 * 3)
    fc1_w = uinit(ks[4], (EMBED_DIM, 128), 128)
    fc1_b = uinit(ks[5], (EMBED_DIM,), 128)
    fc2_w = uinit(ks[6], (OUTPUT_SIZE * EMBED_DIM, EMBED_DIM), EMBED_DIM)
    fc2_b = uinit(ks[7], (OUTPUT_SIZE * EMBED_DIM,), EMBED_DIM)
    params = (conv1_w, conv1_b, conv2_w, conv2_b, fc1_w, fc1_b, fc2_w, fc2_b)

    x = jax.random.normal(ks[8], (B, L), jnp.float32)

    out = conv_seq_reducer_forward(x, params,
                                   output_size=OUTPUT_SIZE, embed_dim=EMBED_DIM)
    out = jax.block_until_ready(out)

    ref = torch_like_reference(x, params,
                               output_size=OUTPUT_SIZE, embed_dim=EMBED_DIM)
    assert out.shape == (OUTPUT_SIZE, EMBED_DIM)
    max_err = float(np.max(np.abs(np.asarray(out) - np.asarray(ref))))
    assert np.allclose(np.asarray(out), np.asarray(ref), rtol=1e-2, atol=1e-2), max_err

    print("KERNEL_OK")
</pallas_src>

<mosaic_0001>
module attributes {stable_mosaic.version = 11 : i64} {
  func.func @kernel(%arg0: memref<32x1xf32, #tpu.memory_space<vmem>>, %arg1: memref<3x64xf32, #tpu.memory_space<vmem>>, %arg2: memref<1x64xf32, #tpu.memory_space<vmem>>, %arg3: memref<192x128xbf16, #tpu.memory_space<vmem>>, %arg4: memref<1x128xf32, #tpu.memory_space<vmem>>, %arg5: memref<128x32xf32, #tpu.memory_space<vmem>>, %arg6: memref<1x32xf32, #tpu.memory_space<vmem>>, %arg7: memref<32x384xf32, #tpu.memory_space<vmem>>, %arg8: memref<1x384xf32, #tpu.memory_space<vmem>>, %arg9: memref<1x384xf32, #tpu.memory_space<vmem>>, %arg10: memref<48x1xf32, #tpu.memory_space<vmem>>, %arg11: memref<32x64xf32, #tpu.memory_space<vmem>>, %arg12: memref<32x64xf32, #tpu.memory_space<vmem>>, %arg13: memref<16x128xf32, #tpu.memory_space<vmem>>) attributes {dimension_semantics = [], scalar_prefetch = 0 : i64, scratch_operands = 4 : i64, tpu.core_type = #tpu.core_type<tc>} {
    %cst = arith.constant 0.000000e+00 : f32
    %0 = vector.broadcast %cst : f32 to vector<48x1xf32>
    %c0 = arith.constant 0 : index
    %c0_0 = arith.constant 0 : index
    %1 = vector.load %arg10[%c0, %c0_0] : memref<48x1xf32, #tpu.memory_space<vmem>>, vector<48x1xf32>
    tpu.vector_store %arg10[%c0, %c0_0], %0 {strides = array<i32>} : memref<48x1xf32, #tpu.memory_space<vmem>>, vector<48x1xf32>,
    %c0_1 = arith.constant 0 : index
    %c0_2 = arith.constant 0 : index
    %2 = vector.load %arg0[%c0_1, %c0_2] : memref<32x1xf32, #tpu.memory_space<vmem>>, vector<32x1xf32>
    %c8 = arith.constant 8 : index
    %c0_3 = arith.constant 0 : index
    %3 = vector.load %arg10[%c8, %c0_3] : memref<48x1xf32, #tpu.memory_space<vmem>>, vector<32x1xf32>
    tpu.vector_store %arg10[%c8, %c0_3], %2 {strides = array<i32>} : memref<48x1xf32, #tpu.memory_space<vmem>>, vector<32x1xf32>,
    %c0_4 = arith.constant 0 : index
    %c0_5 = arith.constant 0 : index
    %4 = vector.load %arg0[%c0_4, %c0_5] : memref<32x1xf32, #tpu.memory_space<vmem>>, vector<32x1xf32>
    %c7 = arith.constant 7 : index
    %c0_6 = arith.constant 0 : index
    %5 = vector.load %arg10[%c7, %c0_6] : memref<48x1xf32, #tpu.memory_space<vmem>>, vector<32x1xf32>
    %c9 = arith.constant 9 : index
    %c0_7 = arith.constant 0 : index
    %6 = vector.load %arg10[%c9, %c0_7] : memref<48x1xf32, #tpu.memory_space<vmem>>, vector<32x1xf32>
    %7 = tpu.iota {dimensions = array<i32: 0>} : vector<32x1xi32>
    %c16_i32 = arith.constant 16 : i32
    %c0_i32 = arith.constant 0 : i32
    %8 = arith.cmpi eq, %c16_i32, %c0_i32 : i32
    %c1_i32 = arith.constant 1 : i32
    %9 = arith.select %8, %c1_i32, %c16_i32 : i32
    %10 = vector.broadcast %9 : i32 to vector<32x1xi32>
    %11 = arith.remsi %7, %10 : vector<32x1xi32>
    %c0_i32_8 = arith.constant 0 : i32
    %12 = vector.broadcast %c0_i32_8 : i32 to vector<32x1xi32>
    %13 = arith.cmpi ne, %11, %12 : vector<32x1xi32>
    %c0_i32_9 = arith.constant 0 : i32
    %14 = vector.broadcast %c0_i32_9 : i32 to vector<32x1xi32>
    %15 = arith.cmpi slt, %11, %14 : vector<32x1xi32>
    %c0_i32_10 = arith.constant 0 : i32
    %16 = arith.cmpi slt, %9, %c0_i32_10 : i32
    %17 = vector.broadcast %16 : i1 to vector<32x1xi1>
    %18 = vector.broadcast %17 : vector<32x1xi1> to vector<32x1xi1>
    %19 = arith.xori %15, %18 : vector<32x1xi1>
    %20 = arith.andi %19, %13 : vector<32x1xi1>
    %21 = vector.broadcast %9 : i32 to vector<32x1xi32>
    %22 = arith.addi %11, %21 : vector<32x1xi32>
    %23 = arith.select %20, %22, %11 : vector<32x1xi1>, vector<32x1xi32>
    %c0_i32_11 = arith.constant 0 : i32
    %24 = vector.broadcast %c0_i32_11 : i32 to vector<32x1xi32>
    %25 = arith.cmpi eq, %23, %24 : vector<32x1xi32>
    %cst_12 = arith.constant 0.000000e+00 : f32
    %26 = vector.broadcast %cst_12 : f32 to vector<32x1xf32>
    %27 = arith.select %25, %26, %5 : vector<32x1xi1>, vector<32x1xf32>
    %c16_i32_13 = arith.constant 16 : i32
    %c0_i32_14 = arith.constant 0 : i32
    %28 = arith.cmpi eq, %c16_i32_13, %c0_i32_14 : i32
    %c1_i32_15 = arith.constant 1 : i32
    %29 = arith.select %28, %c1_i32_15, %c16_i32_13 : i32
    %30 = vector.broadcast %29 : i32 to vector<32x1xi32>
    %31 = arith.remsi %7, %30 : vector<32x1xi32>
    %c0_i32_16 = arith.constant 0 : i32
    %32 = vector.broadcast %c0_i32_16 : i32 to vector<32x1xi32>
    %33 = arith.cmpi ne, %31, %32 : vector<32x1xi32>
    %c0_i32_17 = arith.constant 0 : i32
    %34 = vector.broadcast %c0_i32_17 : i32 to vector<32x1xi32>
    %35 = arith.cmpi slt, %31, %34 : vector<32x1xi32>
    %c0_i32_18 = arith.constant 0 : i32
    %36 = arith.cmpi slt, %29, %c0_i32_18 : i32
    %37 = vector.broadcast %36 : i1 to vector<32x1xi1>
    %38 = vector.broadcast %37 : vector<32x1xi1> to vector<32x1xi1>
    %39 = arith.xori %35, %38 : vector<32x1xi1>
    %40 = arith.andi %39, %33 : vector<32x1xi1>
    %41 = vector.broadcast %29 : i32 to vector<32x1xi32>
    %42 = arith.addi %31, %41 : vector<32x1xi32>
    %43 = arith.select %40, %42, %31 : vector<32x1xi1>, vector<32x1xi32>
    %c15_i32 = arith.constant 15 : i32
    %44 = vector.broadcast %c15_i32 : i32 to vector<32x1xi32>
    %45 = arith.cmpi eq, %43, %44 : vector<32x1xi32>
    %cst_19 = arith.constant 0.000000e+00 : f32
    %46 = vector.broadcast %cst_19 : f32 to vector<32x1xf32>
    %47 = arith.select %45, %46, %6 : vector<32x1xi1>, vector<32x1xf32>
    %c0_20 = arith.constant 0 : index
    %c0_21 = arith.constant 0 : index
    %48 = vector.load %arg1[%c0_20, %c0_21] : memref<3x64xf32, #tpu.memory_space<vmem>>, vector<3x64xf32>
    %49 = vector.extract_strided_slice %48 {offsets = [0, 0], sizes = [1, 64], strides = [1, 1]} : vector<3x64xf32> to vector<1x64xf32>
    %50 = vector.broadcast %27 : vector<32x1xf32> to vector<32x64xf32>
    %51 = vector.broadcast %49 : vector<1x64xf32> to vector<32x64xf32>
    %52 = arith.mulf %50, %51 : vector<32x64xf32>
    %53 = vector.extract_strided_slice %48 {offsets = [1, 0], sizes = [1, 64], strides = [1, 1]} : vector<3x64xf32> to vector<1x64xf32>
    %54 = vector.broadcast %4 : vector<32x1xf32> to vector<32x64xf32>
    %55 = vector.broadcast %53 : vector<1x64xf32> to vector<32x64xf32>
    %56 = arith.mulf %54, %55 : vector<32x64xf32>
    %57 = arith.addf %52, %56 : vector<32x64xf32>
    %58 = vector.extract_strided_slice %48 {offsets = [2, 0], sizes = [1, 64], strides = [1, 1]} : vector<3x64xf32> to vector<1x64xf32>
    %59 = vector.broadcast %47 : vector<32x1xf32> to vector<32x64xf32>
    %60 = vector.broadcast %58 : vector<1x64xf32> to vector<32x64xf32>
    %61 = arith.mulf %59, %60 : vector<32x64xf32>
    %62 = arith.addf %57, %61 : vector<32x64xf32>
    %c0_22 = arith.constant 0 : index
    %c0_23 = arith.constant 0 : index
    %63 = vector.load %arg2[%c0_22, %c0_23] : memref<1x64xf32, #tpu.memory_space<vmem>>, vector<1x64xf32>
    %64 = vector.broadcast %63 : vector<1x64xf32> to vector<32x64xf32>
    %65 = arith.addf %62, %64 : vector<32x64xf32>
    %cst_24 = arith.constant 0.000000e+00 : f32
    %66 = vector.broadcast %cst_24 : f32 to vector<32x64xf32>
    %67 = arith.maximumf %65, %66 : vector<32x64xf32>
    %c0_25 = arith.constant 0 : index
    %c0_26 = arith.constant 0 : index
    %68 = vector.load %arg11[%c0_25, %c0_26] : memref<32x64xf32, #tpu.memory_space<vmem>>, vector<32x64xf32>
    tpu.vector_store %arg11[%c0_25, %c0_26], %67 {strides = array<i32>} : memref<32x64xf32, #tpu.memory_space<vmem>>, vector<32x64xf32>,
    %c0_27 = arith.constant 0 : index
    %c0_28 = arith.constant 0 : index
    %69 = tpu.strided_load %arg11[%c0_27, %c0_28] {strides = array<i32: 2, 1>} : memref<32x64xf32, #tpu.memory_space<vmem>>, vector<16x64xf32>
    %c1 = arith.constant 1 : index
    %c0_29 = arith.constant 0 : index
    %70 = tpu.strided_load %arg11[%c1, %c0_29] {strides = array<i32: 2, 1>} : memref<32x64xf32, #tpu.memory_space<vmem>>, vector<16x64xf32>
    %71 = arith.maximumf %69, %70 : vector<16x64xf32>
    %cst_30 = arith.constant 0.000000e+00 : f32
    %72 = vector.broadcast %cst_30 : f32 to vector<32x64xf32>
    %c0_31 = arith.constant 0 : index
    %c0_32 = arith.constant 0 : index
    %73 = vector.load %arg12[%c0_31, %c0_32] : memref<32x64xf32, #tpu.memory_space<vmem>>, vector<32x64xf32>
    tpu.vector_store %arg12[%c0_31, %c0_32], %72 {strides = array<i32>} : memref<32x64xf32, #tpu.memory_space<vmem>>, vector<32x64xf32>,
    %c8_33 = arith.constant 8 : index
    %c0_34 = arith.constant 0 : index
    %74 = vector.load %arg12[%c8_33, %c0_34] : memref<32x64xf32, #tpu.memory_space<vmem>>, vector<16x64xf32>
    tpu.vector_store %arg12[%c8_33, %c0_34], %71 {strides = array<i32>} : memref<32x64xf32, #tpu.memory_space<vmem>>, vector<16x64xf32>,
    %c7_35 = arith.constant 7 : index
    %c0_36 = arith.constant 0 : index
    %75 = vector.load %arg12[%c7_35, %c0_36] : memref<32x64xf32, #tpu.memory_space<vmem>>, vector<16x64xf32>
    %c9_37 = arith.constant 9 : index
    %c0_38 = arith.constant 0 : index
    %76 = vector.load %arg12[%c9_37, %c0_38] : memref<32x64xf32, #tpu.memory_space<vmem>>, vector<16x64xf32>
    %77 = tpu.iota {dimensions = array<i32: 0>} : vector<16x1xi32>
    %c8_i32 = arith.constant 8 : i32
    %c0_i32_39 = arith.constant 0 : i32
    %78 = arith.cmpi eq, %c8_i32, %c0_i32_39 : i32
    %c1_i32_40 = arith.constant 1 : i32
    %79 = arith.select %78, %c1_i32_40, %c8_i32 : i32
    %80 = vector.broadcast %79 : i32 to vector<16x1xi32>
    %81 = arith.remsi %77, %80 : vector<16x1xi32>
    %c0_i32_41 = arith.constant 0 : i32
    %82 = vector.broadcast %c0_i32_41 : i32 to vector<16x1xi32>
    %83 = arith.cmpi ne, %81, %82 : vector<16x1xi32>
    %c0_i32_42 = arith.constant 0 : i32
    %84 = vector.broadcast %c0_i32_42 : i32 to vector<16x1xi32>
    %85 = arith.cmpi slt, %81, %84 : vector<16x1xi32>
    %c0_i32_43 = arith.constant 0 : i32
    %86 = arith.cmpi slt, %79, %c0_i32_43 : i32
    %87 = vector.broadcast %86 : i1 to vector<16x1xi1>
    %88 = vector.broadcast %87 : vector<16x1xi1> to vector<16x1xi1>
    %89 = arith.xori %85, %88 : vector<16x1xi1>
    %90 = arith.andi %89, %83 : vector<16x1xi1>
    %91 = vector.broadcast %79 : i32 to vector<16x1xi32>
    %92 = arith.addi %81, %91 : vector<16x1xi32>
    %93 = arith.select %90, %92, %81 : vector<16x1xi1>, vector<16x1xi32>
    %c0_i32_44 = arith.constant 0 : i32
    %94 = vector.broadcast %c0_i32_44 : i32 to vector<16x1xi32>
    %95 = arith.cmpi eq, %93, %94 : vector<16x1xi32>
    %cst_45 = arith.constant 0.000000e+00 : f32
    %96 = vector.shape_cast %95 : vector<16x1xi1> to vector<16x1xi1>
    %97 = vector.broadcast %96 : vector<16x1xi1> to vector<16x64xi1>
    %98 = vector.broadcast %cst_45 : f32 to vector<16x64xf32>
    %99 = arith.select %97, %98, %75 : vector<16x64xi1>, vector<16x64xf32>
    %c8_i32_46 = arith.constant 8 : i32
    %c0_i32_47 = arith.constant 0 : i32
    %100 = arith.cmpi eq, %c8_i32_46, %c0_i32_47 : i32
    %c1_i32_48 = arith.constant 1 : i32
    %101 = arith.select %100, %c1_i32_48, %c8_i32_46 : i32
    %102 = vector.broadcast %101 : i32 to vector<16x1xi32>
    %103 = arith.remsi %77, %102 : vector<16x1xi32>
    %c0_i32_49 = arith.constant 0 : i32
    %104 = vector.broadcast %c0_i32_49 : i32 to vector<16x1xi32>
    %105 = arith.cmpi ne, %103, %104 : vector<16x1xi32>
    %c0_i32_50 = arith.constant 0 : i32
    %106 = vector.broadcast %c0_i32_50 : i32 to vector<16x1xi32>
    %107 = arith.cmpi slt, %103, %106 : vector<16x1xi32>
    %c0_i32_51 = arith.constant 0 : i32
    %108 = arith.cmpi slt, %101, %c0_i32_51 : i32
    %109 = vector.broadcast %108 : i1 to vector<16x1xi1>
    %110 = vector.broadcast %109 : vector<16x1xi1> to vector<16x1xi1>
    %111 = arith.xori %107, %110 : vector<16x1xi1>
    %112 = arith.andi %111, %105 : vector<16x1xi1>
    %113 = vector.broadcast %101 : i32 to vector<16x1xi32>
    %114 = arith.addi %103, %113 : vector<16x1xi32>
    %115 = arith.select %112, %114, %103 : vector<16x1xi1>, vector<16x1xi32>
    %c7_i32 = arith.constant 7 : i32
    %116 = vector.broadcast %c7_i32 : i32 to vector<16x1xi32>
    %117 = arith.cmpi eq, %115, %116 : vector<16x1xi32>
    %cst_52 = arith.constant 0.000000e+00 : f32
    %118 = vector.shape_cast %117 : vector<16x1xi1> to vector<16x1xi1>
    %119 = vector.broadcast %118 : vector<16x1xi1> to vector<16x64xi1>
    %120 = vector.broadcast %cst_52 : f32 to vector<16x64xf32>
    %121 = arith.select %119, %120, %76 : vector<16x64xi1>, vector<16x64xf32>
    %c0_53 = arith.constant 0 : index
    %c0_54 = arith.constant 0 : index
    %122 = vector.load %arg3[%c0_53, %c0_54] : memref<192x128xbf16, #tpu.memory_space<vmem>>, vector<192x128xbf16>
    %123 = arith.truncf %99 : vector<16x64xf32> to vector<16x64xbf16>
    %124 = vector.extract_strided_slice %122 {offsets = [0, 0], sizes = [64, 128], strides = [1, 1]} : vector<192x128xbf16> to vector<64x128xbf16>
    %cst_55 = arith.constant dense<0.000000e+00> : vector<16x128xf32>
    %125 = tpu.matmul %123, %124, %cst_55 {dimension_numbers = #tpu.dot_dimension_numbers<[1], [0], [0], [1], [0, 0, 1, 1], [], []>} : vector<16x64xbf16>, vector<64x128xbf16>, vector<16x128xf32> -> vector<16x128xf32>
    %126 = arith.truncf %71 : vector<16x64xf32> to vector<16x64xbf16>
    %127 = vector.extract_strided_slice %122 {offsets = [64, 0], sizes = [64, 128], strides = [1, 1]} : vector<192x128xbf16> to vector<64x128xbf16>
    %cst_56 = arith.constant dense<0.000000e+00> : vector<16x128xf32>
    %128 = tpu.matmul %126, %127, %cst_56 {dimension_numbers = #tpu.dot_dimension_numbers<[1], [0], [0], [1], [0, 0, 1, 1], [], []>} : vector<16x64xbf16>, vector<64x128xbf16>, vector<16x128xf32> -> vector<16x128xf32>
    %129 = arith.addf %125, %128 : vector<16x128xf32>
    %130 = arith.truncf %121 : vector<16x64xf32> to vector<16x64xbf16>
    %131 = vector.extract_strided_slice %122 {offsets = [128, 0], sizes = [64, 128], strides = [1, 1]} : vector<192x128xbf16> to vector<64x128xbf16>
    %cst_57 = arith.constant dense<0.000000e+00> : vector<16x128xf32>
    %132 = tpu.matmul %130, %131, %cst_57 {dimension_numbers = #tpu.dot_dimension_numbers<[1], [0], [0], [1], [0, 0, 1, 1], [], []>} : vector<16x64xbf16>, vector<64x128xbf16>, vector<16x128xf32> -> vector<16x128xf32>
    %133 = arith.addf %129, %132 : vector<16x128xf32>
    %c0_58 = arith.constant 0 : index
    %c0_59 = arith.constant 0 : index
    %134 = vector.load %arg4[%c0_58, %c0_59] : memref<1x128xf32, #tpu.memory_space<vmem>>, vector<1x128xf32>
    %135 = vector.broadcast %134 : vector<1x128xf32> to vector<16x128xf32>
    %136 = arith.addf %133, %135 : vector<16x128xf32>
    %cst_60 = arith.constant 0.000000e+00 : f32
    %137 = vector.broadcast %cst_60 : f32 to vector<16x128xf32>
    %138 = arith.maximumf %136, %137 : vector<16x128xf32>
    %c0_61 = arith.constant 0 : index
    %c0_62 = arith.constant 0 : index
    %139 = vector.load %arg13[%c0_61, %c0_62] : memref<16x128xf32, #tpu.memory_space<vmem>>, vector<16x128xf32>
    tpu.vector_store %arg13[%c0_61, %c0_62], %138 {strides = array<i32>} : memref<16x128xf32, #tpu.memory_space<vmem>>, vector<16x128xf32>,
    %c0_63 = arith.constant 0 : index
    %c0_64 = arith.constant 0 : index
    %140 = tpu.strided_load %arg13[%c0_63, %c0_64] {strides = array<i32: 2, 1>} : memref<16x128xf32, #tpu.memory_space<vmem>>, vector<8x128xf32>
    %c1_65 = arith.constant 1 : index
    %c0_66 = arith.constant 0 : index
    %141 = tpu.strided_load %arg13[%c1_65, %c0_66] {strides = array<i32: 2, 1>} : memref<16x128xf32, #tpu.memory_space<vmem>>, vector<8x128xf32>
    %142 = arith.maximumf %140, %141 : vector<8x128xf32>
    %cst_67 = arith.constant dense<0.000000e+00> : vector<128xf32>
    %143 = vector.multi_reduction <add>, %142, %cst_67 [0] : vector<8x128xf32> to vector<128xf32>
    %144 = vector.shape_cast %143 : vector<128xf32> to vector<1x128xf32>
    %cst_68 = arith.constant 1.250000e-01 : f32
    %145 = vector.broadcast %cst_68 : f32 to vector<1x128xf32>
    %146 = arith.mulf %144, %145 : vector<1x128xf32>
    %c0_69 = arith.constant 0 : index
    %c0_70 = arith.constant 0 : index
    %147 = vector.load %arg5[%c0_69, %c0_70] : memref<128x32xf32, #tpu.memory_space<vmem>>, vector<128x32xf32>
    %cst_71 = arith.constant dense<0.000000e+00> : vector<1x32xf32>
    %148 = tpu.matmul %146, %147, %cst_71 {dimension_numbers = #tpu.dot_dimension_numbers<[1], [0], [0], [1], [0, 0, 1, 1], [], []>} : vector<1x128xf32>, vector<128x32xf32>, vector<1x32xf32> -> vector<1x32xf32>
    %c0_72 = arith.constant 0 : index
    %c0_73 = arith.constant 0 : index
    %149 = vector.load %arg6[%c0_72, %c0_73] : memref<1x32xf32, #tpu.memory_space<vmem>>, vector<1x32xf32>
    %150 = arith.addf %148, %149 : vector<1x32xf32>
    %cst_74 = arith.constant 0.000000e+00 : f32
    %151 = vector.broadcast %cst_74 : f32 to vector<1x32xf32>
    %152 = arith.maximumf %150, %151 : vector<1x32xf32>
    %c0_75 = arith.constant 0 : index
    %c0_76 = arith.constant 0 : index
    %153 = vector.load %arg7[%c0_75, %c0_76] : memref<32x384xf32, #tpu.memory_space<vmem>>, vector<32x384xf32>
    %cst_77 = arith.constant dense<0.000000e+00> : vector<1x384xf32>
    %154 = tpu.matmul %152, %153, %cst_77 {dimension_numbers = #tpu.dot_dimension_numbers<[1], [0], [0], [1], [0, 0, 1, 1], [], []>} : vector<1x32xf32>, vector<32x384xf32>, vector<1x384xf32> -> vector<1x384xf32>
    %c0_78 = arith.constant 0 : index
    %c0_79 = arith.constant 0 : index
    %155 = vector.load %arg8[%c0_78, %c0_79] : memref<1x384xf32, #tpu.memory_space<vmem>>, vector<1x384xf32>
    %156 = arith.addf %154, %155 : vector<1x384xf32>
    %c0_80 = arith.constant 0 : index
    %c0_81 = arith.constant 0 : index
    %157 = vector.load %arg9[%c0_80, %c0_81] : memref<1x384xf32, #tpu.memory_space<vmem>>, vector<1x384xf32>
    tpu.vector_store %arg9[%c0_80, %c0_81], %156 {strides = array<i32>} : memref<1x384xf32, #tpu.memory_space<vmem>>, vector<1x384xf32>,
    return
  }
}

</mosaic_0001>

<bundles_post_ra>
// kernel: tpu_custom_call.1
= control target key start
LH: loop header
LB: loop body
LE: loop exit
PB: predicated region body
PF: predicated region fallthrough
CT: control target
= control target key end

     0   :  { %vm34_vm0 = vcmask 7168   ;;  %v61_v3 = vlaneseq  ;;  %v1087_v4 = vmov 0   ;;  %v1088_v5 = vmov 0.0   ;;  %s1397_s0 = inlined_call_operand.vmem [shape: f32[32,1], index: 0, kind: input, shape index: {}]   ;;  %s1398_s1 = inlined_call_operand.vmem [shape: f32[3,64], index: 1, kind: input, shape index: {}]   ;;  %s1399_s2 = inlined_call_operand.vmem [shape: f32[1,64], index: 2, kind: input, shape index: {}]   ;;  %s1400_s3 = inlined_call_operand.vmem [shape: bf16[192,128], index: 3, kind: input, shape index: {}]   ;;  %s1401_s4 = inlined_call_operand.vmem [shape: f32[1,128], index: 4, kind: input, shape index: {}]   ;;  %s1402_s5 = inlined_call_operand.vmem [shape: f32[128,32], index: 5, kind: input, shape index: {}]   ;;  %s1403_s6 = inlined_call_operand.vmem [shape: f32[1,32], index: 6, kind: input, shape index: {}]   ;;  %s1404_s7 = inlined_call_operand.vmem [shape: f32[32,384], index: 7, kind: input, shape index: {}]   ;;  %s1405_s8 = inlined_call_operand.vmem [shape: f32[1,384], index: 8, kind: input, shape index: {}]   ;;  %s1406_s9 = inlined_call_operand.hbm [shape: f32[1,384], index: 9, kind: output, shape index: {}]  }
   0x1   :  { %v50_v0 = vld [vmem:[%s1397_s0 + $0x8] sm:$0xff]  ;;  %v49_v1 = vld [vmem:[%s1397_s0] sm:$0xff]  ;;  %v43_v2 = vld [vmem:[%s1397_s0 + $0x10] sm:$0xff]  ;;  %1050 = vset.pattern.permute.xlu1 %v1087_v4  ;;  %1049 = vset.pattern.permute.xlu0 %v1087_v4  ;;  %38 = vst.msk [vmem:[#allocation2 + $0x18] sm:$0xff] %vm34_vm0, %v1088_v5 }
   0x2   :  { %39 = vst.msk [vmem:[#allocation2 + $0x20] sm:$0xff] %vm34_vm0, %v1088_v5  ;;  %v44_v6 = vld [vmem:[%s1397_s0 + $0x18] sm:$0xff]  ;;  %35 = vst.msk [vmem:[#allocation2] sm:$0xff] %vm34_vm0, %v1088_v5  ;;  %166 = vperm.xlu1 %1050, %v50_v0   ;;  %161 = vperm.xlu0 %1049, %v49_v1   ;;  %v1172_v7 = vshrl.u32 %v61_v3, 7 }
   0x3   :  { %36 = vst.msk [vmem:[#allocation2 + $0x8] sm:$0xff] %vm34_vm0, %v1088_v5  ;;  %37 = vst.msk [vmem:[#allocation2 + $0x10] sm:$0xff] %vm34_vm0, %v1088_v5  ;;  %923 = vmatprep.subr.bf16.mxu0 %v1088_v5  ;;  %935 = vmatprep.subr.bf16.mxu1 %v1088_v5 }
   0x4   :  { %40 = vst.msk [vmem:[#allocation2 + $0x28] sm:$0xff] %vm34_vm0, %v1088_v5  ;;  %47 = vst.msk [vmem:[#allocation2 + $0x18] sm:$0xff] %vm34_vm0, %v43_v2  ;;  %v64_v8 = vadd.s32 16, %v1172_v7  ;;  %v70_v9 = vand.u32 15, %v1172_v7  ;;  %v1179_v11 = vadd.s32 8, %v1172_v7  ;;  %v65_v19 = vadd.s32 24, %v1172_v7 }
   0x5   :  { %48 = vst.msk [vmem:[#allocation2 + $0x20] sm:$0xff] %vm34_vm0, %v44_v6  ;;  %45 = vst.msk [vmem:[#allocation2 + $0x8] sm:$0xff] %vm34_vm0, %v49_v1 }
   0x6   :  { %46 = vst.msk [vmem:[#allocation2 + $0x10] sm:$0xff] %vm34_vm0, %v50_v0  ;;  %v84_v10 = vand.u32 15, %v64_v8  ;;  %vm114_vm2 = vcmp.eq.s32.totalorder %v70_v9, 0  ;;  %v77_v18 = vand.u32 15, %v1179_v11 }
   0x8   :  { %vm116_vm1 = vcmp.eq.s32.totalorder %v84_v10, 0 }
   0xc   :  { %v56_v12 = vld [vmem:[#allocation2 + $0x1f] sm:$0xff]  ;;  %v53_v15 = vld [vmem:[#allocation2 + $0x7] sm:$0xff] }
   0xd   :  { %v54_v13 = vld [vmem:[#allocation2 + $0xf] sm:$0xff]  ;;  %v55_v14 = vld [vmem:[#allocation2 + $0x17] sm:$0xff]  ;;  %148 = vperm.xlu1 %1050, %v56_v12   ;;  %v118_v17 = vsel %vm114_vm2, 0.0, %v53_v15 }
   0xe   :  { %138 = vperm.xlu0 %1049, %v54_v13   ;;  %v120_v16 = vsel %vm116_vm1, 0.0, %v55_v14 }
  0x11   :  { %143 = vperm.xlu1 %1050, %v120_v16  }
  0x12   :  { %133 = vperm.xlu0 %1049, %v118_v17  }
  0x13   :  { %14 = vsyncpa [#allocation7], 0  ;;  %v58_v20 = vld [vmem:[#allocation2 + $0x11] sm:$0xff]  ;;  %vm123_vm3 = vcmp.eq.s32.totalorder %v77_v18, 15  ;;  %v91_v21 = vand.u32 15, %v65_v19  ;;  %v57_v23 = vld [vmem:[#allocation2 + $0x9] sm:$0xff] }
  0x14   :  { %v127_v22 = vsel %vm123_vm3, 0.0, %v58_v20  ;;  %v60_v24 = vld [vmem:[#allocation2 + $0x21] sm:$0xff]  ;;  %vm238_vm5 = vcmask 523264   ;;  %v59_v26 = vld [vmem:[#allocation2 + $0x19] sm:$0xff]  ;;  %vm1089_vm6 = vmmov 0   ;;  %v1055_v32 = vld [vmem:[%s1400_s3 + $0x38] sm:$0xff]  }
  0x15   :  { %176 = vperm.xlu1 %1050, %v44_v6   ;;  %vm125_vm4 = vcmp.eq.s32.totalorder %v91_v21, 15  ;;  %252 = vst.msk [vmem:[#allocation4] sm:$0xff] %vm238_vm5, %v1088_v5  ;;  %253 = vst.msk [vmem:[#allocation4 + $0x8] sm:$0xff] %vm238_vm5, %v1088_v5  ;;  %v1051_v27 = vld [vmem:[%s1400_s3 + $0x20] sm:$0xff]   ;;  %v1052_v28 = vld [vmem:[%s1400_s3 + $0x28] sm:$0xff]   ;;  %931 = vmatprep.mubr.msk.bf16.mxu0 %vm1089_vm6, %v1088_v5  ;;  %v153_v39 = vsub.s32 0, %v1172_v7 }
  0x16   :  { %171 = vperm.xlu0 %1049, %v43_v2   ;;  %254 = vst.msk [vmem:[#allocation4 + $0x10] sm:$0xff] %vm238_vm5, %v1088_v5  ;;  %255 = vst.msk [vmem:[#allocation4 + $0x18] sm:$0xff] %vm238_vm5, %v1088_v5  ;;  %v129_v25 = vsel %vm125_vm4, 0.0, %v60_v24  ;;  %924 = vmatpush3.bf16.msra.mxu0 %v1051_v27  ;;  %v1053_v29 = vld [vmem:[%s1400_s3 + $0x30] sm:$0xff]   ;;  %v1054_v30 = vld [vmem:[%s1400_s3] sm:$0xff]   ;;  %v181_v40 = vsub.s32 1, %v1172_v7 }
  0x17   :  { %925 = vmatprep.subr.bf16.mxu0 %v1088_v5  ;;  %936 = vmatpush3.bf16.msra.mxu1 %v1054_v30  ;;  %v1056_v31 = vld [vmem:[%s1400_s3 + $0x8] sm:$0xff]   ;;  %v1058_v33 = vld [vmem:[%s1400_s3 + $0x10] sm:$0xff]   ;;  %v1060_v34 = vld [vmem:[%s1400_s3 + $0x18] sm:$0xff]   ;;  %v213_v45 = vsub.s32 2, %v1172_v7  ;;  %vm676_vm11 = vcmask 261120   ;;  %vm850_vm12 = vcmp.lt.s32.totalorder %v61_v3, 384 }
  0x18   :  { %943 = vmatprep.mubr.msk.bf16.mxu1 %vm1089_vm6, %v1088_v5  ;;  %937 = vmatprep.subr.bf16.mxu1 %v1088_v5  ;;  %v130_v41 = vld [vmem:[%s1398_s1] sm:$0x7] }
  0x19   :  { %198 = vperm.xlu1 %1050, %v127_v22   ;;  %v154_v44 = vrot.slane %v130_v41, %v153_v39  ;;  %v182_v46 = vrot.slane %v130_v41, %v181_v40  ;;  %v214_v51 = vrot.slane %v130_v41, %v213_v45  ;;  %v867_v0 = vld [vmem:[%s1399_s2] ss:$0 sm:$0xff] }
  0x1a   :  { %193 = vperm.xlu0 %1049, %v57_v23   ;;  %926 = vmatpush3.bf16.msra.mxu0 %v1052_v28 }
  0x1b   :  { %927 = vmatprep.subr.bf16.mxu0 %v1088_v5  ;;  %938 = vmatpush3.bf16.msra.mxu1 %v1056_v31  ;;  %v273_v31 = vand.u32 7, %v1179_v11  ;;  %v1061_v11 = vld [vmem:[%s1400_s3 + $0x50] sm:$0xff]  }
  0x1c   :  { %939 = vmatprep.subr.bf16.mxu1 %v1088_v5 }
  0x1d   :  { %208 = vperm.xlu1 %1050, %v129_v25   ;;  %vm287_vm7 = vcmp.eq.s32.totalorder %v273_v31, 0  ;;  %vm295_vm9 = vcmp.eq.s32.totalorder %v273_v31, 7 }
  0x1e   :  { %203 = vperm.xlu0 %1049, %v59_v26   ;;  %928 = vmatpush3.bf16.msra.mxu0 %v1053_v29  ;;  %v1057_v29 = vld [vmem:[%s1400_s3 + $0x40] sm:$0xff]  }
  0x1f   :  { %929 = vmatprep.subr.bf16.mxu0 %v1088_v5  ;;  %940 = vmatpush3.bf16.msra.mxu1 %v1058_v33  ;;  %v1059_v33 = vld [vmem:[%s1400_s3 + $0x48] sm:$0xff]  }
  0x20   :  { %941 = vmatprep.subr.bf16.mxu1 %v1088_v5 }
  0x22   :  { %930 = vmatpush3.bf16.msra.mxu0 %v1055_v32  ;;  %v266_v32 = vand.u32 7, %v1172_v7 }
  0x23   :  { %947 = vmatprep.subr.bf16.mxu0 %v1088_v5  ;;  %942 = vmatpush3.bf16.msra.mxu1 %v1060_v34 }
  0x24   :  { %vm286_vm8 = vcmp.eq.s32.totalorder %v266_v32, 0  ;;  %vm294_vm10 = vcmp.eq.s32.totalorder %v266_v32, 7 }
  0x81   :  { %v167_v35 = vpop.permute.xlu1 %166  ;;  %v162_v36 = vpop.permute.xlu0 %161 }
  0x82   :  { %v184_v52 = vmul.f32 %v182_v46, %v167_v35  ;;  %v183_v53 = vmul.f32 %v182_v46, %v162_v36 }
  0x8c   :  { %v149_v37 = vpop.permute.xlu1 %148 }
  0x8d   :  { %v139_v38 = vpop.permute.xlu0 %138  ;;  %v158_v62 = vmul.f32 %v154_v44, %v149_v37 }
  0x8e   :  { %v156_v49 = vmul.f32 %v154_v44, %v139_v38 }
  0x90   :  { %v144_v42 = vpop.permute.xlu1 %143  ;;  %v188_v58 = vadd.f32 %v184_v52, %v156_v49  ;;  %v560_v49 = vld [vmem:[%s1402_s5 + $0x8] sm:$0xff]  ;;  %v561_v52 = vld [vmem:[%s1402_s5 + $0x10] sm:$0xff] }
  0x91   :  { %v134_v43 = vpop.permute.xlu0 %133  ;;  %v157_v63 = vmul.f32 %v154_v44, %v144_v42 }
  0x92   :  { %v155_v50 = vmul.f32 %v154_v44, %v134_v43  ;;  %v1062_v43 = vld [vmem:[%s1400_s3 + $0x58] sm:$0xff]  }
  0x94   :  { %v177_v47 = vpop.permute.xlu1 %176  ;;  %v187_v59 = vadd.f32 %v183_v53, %v155_v50  ;;  %v562_v53 = vld [vmem:[%s1402_s5 + $0x18] sm:$0xff] }
  0x95   :  { %v172_v48 = vpop.permute.xlu0 %171  ;;  %v186_v54 = vmul.f32 %v182_v46, %v177_v47 }
  0x96   :  { %v185_v55 = vmul.f32 %v182_v46, %v172_v48  ;;  %v559_v48 = vld [vmem:[%s1402_s5] sm:$0xff] }
  0x97   :  { %v190_v4 = vadd.f32 %v186_v54, %v158_v62  ;;  %v1006_v50 = vpack.c.bf16 %v560_v49, %v559_v48  ;;  %v1009_v54 = vpack.c.bf16 %v562_v53, %v561_v52  ;;  %v568_v62 = vld [vmem:[%s1402_s5 + $0x48] sm:$0xff]  ;;  %v654_v53 = vld [vmem:[%s1404_s7 + $0x38] sm:$0xff] }
  0x98   :  { %v199_v56 = vpop.permute.xlu1 %198  ;;  %v189_v6 = vadd.f32 %v185_v55, %v157_v63  ;;  %v563_v55 = vld [vmem:[%s1402_s5 + $0x20] sm:$0xff] }
  0x99   :  { %v194_v57 = vpop.permute.xlu0 %193  ;;  %v216_v60 = vmul.f32 %v214_v51, %v199_v56  ;;  %v564_v56 = vld [vmem:[%s1402_s5 + $0x28] sm:$0xff] }
  0x9a   :  { %v215_v61 = vmul.f32 %v214_v51, %v194_v57  ;;  %v1012_v57 = vpack.c.bf16 %v564_v56, %v563_v55  ;;  %v653_v56 = vld [vmem:[%s1404_s7 + $0x30] sm:$0xff] }
  0x9b   :  { %v220_v1 = vadd.f32 %v216_v60, %v188_v58  ;;  %v565_v58 = vld [vmem:[%s1402_s5 + $0x30] sm:$0xff] }
  0x9c   :  { %v219_v2 = vadd.f32 %v215_v61, %v187_v59  ;;  %v209_v8 = vpop.permute.xlu1 %208  ;;  %v566_v59 = vld [vmem:[%s1402_s5 + $0x38] sm:$0xff]  ;;  %v567_v61 = vld [vmem:[%s1402_s5 + $0x40] sm:$0xff] }
  0x9d   :  { %v204_v9 = vpop.permute.xlu0 %203  ;;  %v231_v10 = vadd.f32 %v867_v0, %v220_v1  ;;  %v218_v13 = vmul.f32 %v214_v51, %v209_v8  ;;  %v1015_v60 = vpack.c.bf16 %v566_v59, %v565_v58  ;;  %v1018_v63 = vpack.c.bf16 %v568_v62, %v567_v61  ;;  %v570_v1 = vld [vmem:[%s1402_s5 + $0x58] sm:$0xff]  ;;  %v575_v59 = vld [vmem:[%s1403_s6] sm:$0x1]  ;;  %v652_v61 = vld [vmem:[%s1404_s7 + $0x28] sm:$0xff] }
  0x9e   :  { %v230_v12 = vadd.f32 %v867_v0, %v219_v2  ;;  %v217_v14 = vmul.f32 %v214_v51, %v204_v9  ;;  %v1090_v51 = vmov 0.0|0.0   ;;  %v573_v9 = vld [vmem:[%s1402_s5 + $0x70] sm:$0xff] }
  0x9f   :  { %v235_v15 = vmax.f32 %v231_v10, 0.0  ;;  %v222_v17 = vadd.f32 %v218_v13, %v190_v4  ;;  %1005 = vmatprep.subr.bf16.mxu1 %v1090_v51  ;;  %v571_v4 = vld [vmem:[%s1402_s5 + $0x60] sm:$0xff]  ;;  %v574_v10 = vld [vmem:[%s1402_s5 + $0x78] sm:$0xff]  ;;  %v648_v13 = vld [vmem:[%s1404_s7 + $0x8] sm:$0xff] }
  0xa0   :  { %v234_v16 = vmax.f32 %v230_v12, 0.0  ;;  %v221_v18 = vadd.f32 %v217_v14, %v189_v6  ;;  %v572_v6 = vld [vmem:[%s1402_s5 + $0x68] sm:$0xff]  ;;  %v1027_v12 = vpack.c.bf16 %v574_v10, %v573_v9  ;;  %v651_v14 = vld [vmem:[%s1404_s7 + $0x20] sm:$0xff] }
  0xa1   :  { %240 = vst.msk [vmem:[#allocation3 + $0x8] sm:$0xff] %vm238_vm5, %v235_v15  ;;  %v233_v19 = vadd.f32 %v867_v0, %v222_v17  ;;  %v1024_v8 = vpack.c.bf16 %v572_v6, %v571_v4  ;;  %v647_v15 = vld [vmem:[%s1404_s7] sm:$0xff]  ;;  %v650_v17 = vld [vmem:[%s1404_s7 + $0x18] sm:$0xff] }
  0xa2   :  { %239 = vst.msk [vmem:[#allocation3] sm:$0xff] %vm238_vm5, %v234_v16  ;;  %v232_v20 = vadd.f32 %v867_v0, %v221_v18  ;;  %v569_v0 = vld [vmem:[%s1402_s5 + $0x50] sm:$0xff]  ;;  %v1029_v16 = vpack.c.bf16 %v651_v14, %v648_v13  ;;  %v1031_v18 = vpack.c.bf16 %v650_v17, %v647_v15  ;;  %v655_v4 = vld [vmem:[%s1404_s7 + $0x40] sm:$0xff]  ;;  %v658_v6 = vld [vmem:[%s1404_s7 + $0x58] sm:$0xff]  ;;  %v1091_v13 = vmov 1966171168  }
  0xa3   :  { %v237_v21 = vmax.f32 %v233_v19, 0.0  ;;  %v1021_v2 = vpack.c.bf16 %v570_v1, %v569_v0  ;;  %v659_v9 = vld [vmem:[%s1405_s8] sm:$0x7]  ;;  %v826_v14 = vunpack.c.l.s4 %v1091_v13 }
  0xa4   :  { %v236_v22 = vmax.f32 %v232_v20, 0.0  ;;  %v664_v10 = vrot.slane %v659_v9, %v153_v39 }
  0xa5   :  { %242 = vst.msk [vmem:[#allocation3 + $0x18] sm:$0xff] %vm238_vm5, %v237_v21 }
  0xa6   :  { %241 = vst.msk [vmem:[#allocation3 + $0x10] sm:$0xff] %vm238_vm5, %v236_v22 }
  0xa9   :  { %v243_v23 = vld [vmem:[#allocation3] ss:$2 sm:$0xff]  ;;  %v247_v24 = vld [vmem:[#allocation3 + $0x1] ss:$2 sm:$0xff] }
  0xaa   :  { %v250_v25 = vmax.f32 %v243_v23, %v247_v24 }
  0xac   :  { %256 = vst.msk [vmem:[#allocation4 + $0x8] sm:$0xff] %vm238_vm5, %v250_v25 }
  0xad   :  { %v245_v26 = vld [vmem:[#allocation3 + $0x10] ss:$2 sm:$0xff]  ;;  %v249_v27 = vld [vmem:[#allocation3 + $0x11] ss:$2 sm:$0xff] }
  0xae   :  { %v251_v28 = vmax.f32 %v245_v26, %v249_v27 }
  0xb0   :  { %257 = vst.msk [vmem:[#allocation4 + $0x10] sm:$0xff] %vm238_vm5, %v251_v28  ;;  %v327_v30 = vpack.c.bf16 %v251_v28, %v250_v25 }
  0xb2   :  { %932 = vmatmul.mubr.msk.bf16.vlgmr.msra.gmra.mrb[0].mxu0 %vm238_vm5, %v327_v30  ;;  %v883_v30 = vld [vmem:[%s1401_s4] ss:$0 sm:$0xff] }
  0xb3   :  { %948 = vmatpush3.bf16.msra.mxu0 %v1057_v29  ;;  %955 = vmatprep.mubr.msk.bf16.mxu0 %vm1089_vm6, %v1088_v5  ;;  %v258_v34 = vld [vmem:[#allocation4 + $0x7] sm:$0xff] }
  0xb4   :  { %949 = vmatprep.subr.bf16.mxu0 %v1088_v5  ;;  %v292_v36 = vsel %vm286_vm8, 0.0, %v258_v34 }
  0xb7   :  { %950 = vmatpush3.bf16.msra.mxu0 %v1059_v33  ;;  %v259_v35 = vld [vmem:[#allocation4 + $0xf] sm:$0xff] }
  0xb8   :  { %951 = vmatprep.subr.bf16.mxu0 %v1088_v5  ;;  %v293_v37 = vsel %vm287_vm7, 0.0, %v259_v35  ;;  %v260_v41 = vld [vmem:[#allocation4 + $0x9] sm:$0xff]  ;;  %v261_v42 = vld [vmem:[#allocation4 + $0x11] sm:$0xff] }
  0xb9   :  { %v326_v38 = vpack.c.bf16 %v293_v37, %v292_v36  ;;  %v300_v44 = vsel %vm294_vm10, 0.0, %v260_v41  ;;  %v301_v46 = vsel %vm295_vm9, 0.0, %v261_v42 }
  0xba   :  { %v464_v47 = vpack.c.bf16 %v301_v46, %v300_v44 }
  0xbb   :  { %952 = vmatpush3.bf16.msra.mxu0 %v1061_v11  ;;  %944 = vmatmul.mubr.msk.bf16.vlgmr.msra.gmra.mrb[0].mxu1 %vm238_vm5, %v326_v38 }
  0xbc   :  { %953 = vmatprep.subr.bf16.mxu0 %v1088_v5  ;;  %991 = vmatprep.mubr.msk.f32.mxu1 %vm1089_vm6, %v1088_v5 }
  0xbd   :  { %1007 = vmatpush3.bf16.msra.mxu1 %v1006_v50 }
  0xbe   :  { %1008 = vmatprep.subr.bf16.mxu1 %v1090_v51 }
  0xbf   :  { %954 = vmatpush3.bf16.msra.mxu0 %v1062_v43 }
  0xc0   :  { %1030 = vmatprep.subr.bf16.mxu0 %v1029_v16 }
  0xc1   :  { %1010 = vmatpush3.bf16.msra.mxu1 %v1009_v54  ;;  %v657_v54 = vld [vmem:[%s1404_s7 + $0x50] sm:$0xff] }
  0xc2   :  { %956 = vmatmul.mubr.msk.bf16.vlgmr.msra.gmra.mrb[4].mxu0 %vm238_vm5, %v464_v47  ;;  %1011 = vmatprep.subr.bf16.mxu1 %v1090_v51  ;;  %v1033_v55 = vpack.c.bf16 %v657_v54, %v654_v53 }
  0xc3   :  { %744 = vmatprep.mubr.f32.mxu0 %v1088_v5  ;;  %1032 = vmatpush1.bf16.msra.mxu0 %v1031_v18  ;;  %v827_v18 = vunpack.c.0.s8 %v826_v14 }
  0xc4   :  { %1034 = vmatprep.subr.bf16.mxu0 %v1033_v55 }
  0xc5   :  { %1013 = vmatpush3.bf16.msra.mxu1 %v1012_v57  ;;  %v656_v57 = vld [vmem:[%s1404_s7 + $0x48] sm:$0xff] }
  0xc6   :  { %1014 = vmatprep.subr.bf16.mxu1 %v1090_v51  ;;  %v1035_v58 = vpack.c.bf16 %v656_v57, %v653_v56 }
  0xc8   :  { %1036 = vmatpush1.bf16.msra.mxu0 %v1035_v58 }
  0xc9   :  { %1016 = vmatpush3.bf16.msra.mxu1 %v1015_v60  ;;  %1037 = vmatprep.subr.bf16.mxu0 %v1090_v51  ;;  %v649_v60 = vld [vmem:[%s1404_s7 + $0x10] sm:$0xff]  ;;  %s1092_s7 = smov [#allocation6]  }
  0xca   :  { %1017 = vmatprep.subr.bf16.mxu1 %v1090_v51  ;;  %v1038_v1 = vpack.c.bf16 %v652_v61, %v649_v60  ;;  %s859_s8 = sshll.u32 %s1092_s7, 4  ;;  %s860_s8 = int_to_ptr.vmem [resolvable:$true] %s859_s8 }
  0xcb   :  { %s1063_s28 = scalar_lea.vmem %s860_s8, 48  ;;  %s1067_s29 = scalar_lea.vmem %s860_s8, 64 }
  0xcc   :  { %p1064_p0 = scmp.ne.s32.totalorder %s860_s8, %s1063_s28  ;;  %p1068_p1 = scmp.lt.s32.totalorder %s860_s8, %s860_s8 }
  0xcd   :  { %1019 = vmatpush3.bf16.msra.mxu1 %v1018_v63  ;;  %p1069_p2 = scmp.lt.s32.totalorder %s1067_s29, %s1063_s28 }
  0xce   :  { %1020 = vmatprep.subr.bf16.mxu1 %v1090_v51 }
  0xcf   :  { %p1070_p3 = por %p1069_p2, %p1068_p1 }
  0xd1   :  { %1022 = vmatpush3.bf16.msra.mxu1 %v1021_v2  ;;  %p1071_p4 = pnand %p1070_p3, %p1064_p0 }
  0xd2   :  { %1023 = vmatprep.subr.bf16.mxu1 %v1090_v51 }
  0xd5   :  { %1025 = vmatpush3.bf16.msra.mxu1 %v1024_v8  ;;  %v1041_v8 = vpack.c.bf16 %v658_v6, %v655_v4 }
  0xd6   :  { %1026 = vmatprep.subr.bf16.mxu1 %v1090_v51 }
  0xd9   :  { %1028 = vmatpush3.bf16.msra.mxu1 %v1027_v12  ;;  %v668_v12 = vrot.slane %v659_v9, %v181_v40 }
 0x185   :  { %v389_v19 = vpop.f32.mrb[0].mxu0 }
 0x186   :  { %v933_v20 = vpop.f32.mrb[1].mxu0 }
 0x187   :  { %v392_v21 = vpop.f32.mrb[2].mxu0  ;;  %v830_v20 = vsub.s32 %v827_v18, %v1172_v7 }
 0x188   :  { %v934_v22 = vpop.f32.mrb[3].mxu0 }
 0x18e   :  { %v457_v23 = vpop.f32.mrb[0].mxu1 }
 0x18f   :  { %v458_v24 = vadd.f32 %v457_v23, %v389_v19  ;;  %v945_v25 = vpop.f32.mrb[1].mxu1  ;;  %v672_v19 = vrot.slane %v659_v9, %v213_v45 }
 0x190   :  { %v460_v26 = vpop.f32.mrb[2].mxu1 }
 0x191   :  { %v461_v27 = vadd.f32 %v460_v26, %v392_v21  ;;  %v946_v28 = vpop.f32.mrb[3].mxu1 }
 0x195   :  { %v526_v29 = vpop.f32.mrb[4].mxu0 }
 0x196   :  { %v533_v31 = vadd.f32 %v526_v29, %v458_v24  ;;  %v957_v32 = vpop.f32.mrb[5].mxu0 }
 0x197   :  { %v529_v33 = vpop.f32.mrb[6].mxu0 }
 0x198   :  { %v542_v34 = vadd.f32 %v883_v30, %v533_v31  ;;  %v534_v11 = vadd.f32 %v529_v33, %v461_v27  ;;  %v958_v35 = vpop.f32.mrb[7].mxu0 }
 0x19a   :  { %v544_v36 = vmax.f32 %v542_v34, 0.0  ;;  %v543_v37 = vadd.f32 %v883_v30, %v534_v11 }
 0x19c   :  { %546 = vst [vmem:[#allocation5] sm:$0xff] %v544_v36  ;;  %v545_v38 = vmax.f32 %v543_v37, 0.0 }
 0x19e   :  { %547 = vst [vmem:[#allocation5 + $0x8] sm:$0xff] %v545_v38 }
 0x1a5   :  { %v548_v41 = vld [vmem:[#allocation5] ss:$2 sm:$0xff]  ;;  %v550_v42 = vld [vmem:[#allocation5 + $0x1] ss:$2 sm:$0xff] }
 0x1a6   :  { %v551_v43 = vmax.f32 %v548_v41, %v550_v42 }
 0x1a8   :  { %v552_v44 = vrot.slane %v551_v43, 4 }
 0x1aa   :  { %v553_v46 = vadd.f32 %v552_v44, %v551_v43 }
 0x1ac   :  { %v554_v47 = vrot.slane %v553_v46, 2 }
 0x1ae   :  { %v555_v48 = vadd.f32 %v554_v47, %v553_v46 }
 0x1b0   :  { %v556_v49 = vrot.slane %v555_v48, 1 }
 0x1b2   :  { %v557_v50 = vadd.f32 %v556_v49, %v555_v48 }
 0x1b4   :  { %v558_v52 = vmul.f32 0.125, %v557_v50 }
 0x1b6   :  { %992 = vmatmul.mubr.f32.vlgmr.msra.gmra.mrb[4].mxu1 %v558_v52 }
 0x289   :  { %v642_v62 = vpop.f32.mrb[4].mxu1 }
 0x28a   :  { %v643_v63 = vadd.f32 %v642_v62, %v575_v59  ;;  %v993_v0 = vpop.f32.mrb[5].mxu1 }
 0x28c   :  { %v646_v2 = vmax.f32 %v643_v63, 0.0 }
 0x28e   :  { %884 = vmatmul.mubr.msk.f32.vlgmr.msra.gmra.mrb[8].mxu0 %vm676_vm11, %v646_v2 }
 0x28f   :  { %1039 = vmatpush3.bf16.msra.mxu0 %v1038_v1  ;;  %1002 = vmatprep.mubr.msk.f32.mxu0 %vm1089_vm6, %v1088_v5 }
 0x290   :  { %1040 = vmatprep.subr.bf16.mxu0 %v1090_v51 }
 0x293   :  { %1042 = vmatpush3.bf16.msra.mxu0 %v1041_v8 }
 0x296   :  { %1003 = vmatmul.mubr.msk.f32.vlgmr.msra.gmra.mrb[10].mxu0 %vm676_vm11, %v646_v2 }
 0x361   :  { %v746_v15 = vpop.f32.mrb[8].mxu0 }
 0x362   :  { %v747_v16 = vadd.f32 %v746_v15, %v664_v10  ;;  %v748_v17 = vpop.f32.mrb[9].mxu0 }
 0x363   :  { %v749_v5 = vadd.f32 %v748_v17, %v668_v12 }
 0x365   :  { %v824_v51 = vcombine.low %v747_v16, %v749_v5 }
 0x367   :  { %v831_v39 = vrot.slane %v824_v51, %v830_v20 }
 0x369   :  { %v817_v21 = vpop.f32.mrb[10].mxu0 }
 0x36a   :  { %v818_v22 = vadd.f32 %v817_v21, %v672_v19  ;;  %v1004_v23 = vpop.f32.mrb[11].mxu0 }
 0x36c   :  { %v838_v24 = vrot.slane %v818_v22, %v830_v20 }
 0x36e   :  { %v839_v40 = vcombine.low %v831_v39, %v838_v24 }
 0x370   :  { %v846_v25 = vrot.slane %v839_v40, %v830_v20 }
 0x372   :  { %852 = vst.msk [vmem:[#allocation6] sm:$0x7] %vm850_vm12, %v846_v25 }
 0x373   :  { %1074 = shalt.err (!%p1071_p4)
}
 0x374   :  { %s1075_s11 = scalar_lea.hbm %s1406_s9, 48 }
 0x375   :  { %p1076_p5 = scmp.ne.s32.totalorder %s1406_s9, %s1075_s11  ;;  %p1079_p6 = scmp.lt.u32.totalorder %s1075_s11, %s1406_s9 }
 0x377   :  { %p1081_p7 = pnand %p1079_p6, %p1076_p5 }
 0x379   :  { %1084 = shalt.err (!%p1081_p7)
}
 0x37a   :  { %862 = dma.vmem_to_hbm [thread:$0]  %s860_s8, 48, %s1406_s9, [#allocation7]  }
 0x37b   :  { %1085 = dma.done.wait [#allocation7], 48  }
 0x37c   :  { %1086 = vsyncadd [#allocation7], 4294967248 }
 0x37d   :  { %866 = vsyncpa [#allocation7], 1 }

</bundles_post_ra>
